<compile_context>
chip_gen: v6e
topology: v6e:2x2x1
jax: 0.10.0
libtpu: 0.0.40
codegen_flags: <defaults>
</compile_context>

<pallas_src>
import math

import jax
import jax.numpy as jnp
from jax.experimental import pallas as pl
from jax.experimental.pallas import tpu as pltpu

IGNORE_THRES = 0.5
OBJ_SCALE = 1.0
NOOBJ_SCALE = 10.0
ALPHA = 0.25
EPS = 1e-16


def _cdiv(a, b):
    return -(-a // b)


def _round_up(a, b):
    return _cdiv(a, b) * b


def _noobj_bce(pc):
    # Focal BCE restricted to the noobj branch (y == 0):
    #   -(1 - alpha) * pc^2 * log(1 - pc + eps)
    # Valid as the full BCE at noobj cells because noobj_mask==1 => obj==0.
    # Note f(0) == 0 exactly, so zero padding contributes nothing.
    return -(1.0 - ALPHA) * pc * pc * jnp.log((1.0 - pc) + EPS)


# ----------------------------------------------------------------------------
# Pallas kernel: per-block partial sums of the noobj-branch focal BCE.
# ----------------------------------------------------------------------------
def _noobj_bce_block_kernel(pc_ref, out_ref):
    # pc_ref: (R, TN) f32 tile of pred_conf, fully sublane/lane dense.
    f = _noobj_bce(pc_ref[...])
    # One cross-lane reduce (XLU) + a tiny (R, 1) store per grid step; no
    # VMEM accumulator vld/vst and no init/finalize phases.
    out_ref[...] = f.sum(axis=1, keepdims=True)


def pallas_noobj_full_sums(confs):
    """confs: list of (nB, N_i) float32 pred_conf per scale.

    Returns a list of per-scale (nB,) float32 arrays: the per-batch sum of
    the noobj-branch focal BCE over ALL N_i cells of that scale.
    One fused pallas_call streams every scale."""
    nB = confs[0].shape[0]
    n_cells = [int(c.shape[1]) for c in confs]

    # Rows-per-batch SB: make R = nB*SB a multiple of 8 (full f32 sublane
    # occupancy), then grow toward ~32 rows while every scale still yields
    # >= 128 columns (bounds zero-padding waste of the smallest scale).
    SB = 8 // math.gcd(nB, 8)
    while nB * SB < 32 and min(_cdiv(n, SB * 2) for n in n_cells) >= 128:
        SB *= 2
    R = nB * SB

    # Lane-tile width: multiple of 128, bounded by the smallest scale's column
    # count (padding waste) and a conservative VMEM budget (fits v5e's 16 MiB
    # default scoped VMEM even with triple buffering).
    cols = [_cdiv(n, SB) for n in n_cells]
    tn_cols = max(128, _round_up(min(cols), 128))
    tn_vmem = max(128, ((8 * 1024 * 1024) // (R * 4 * 3)) // 128 * 128)
    TN = min(4096, tn_cols, tn_vmem)

    # Pad each scale independently to a whole number of (R, TN) column blocks
    # (zero pad: f(0) == 0, so no in-kernel tail masking is needed), fold the
    # batch rows, and concatenate the scales along the column axis so every
    # grid step belongs to exactly one (statically known) scale.
    segs, Ks = [], []
    for c, n in zip(confs, n_cells):
        M = _round_up(_cdiv(n, SB), TN)
        seg = jnp.pad(c, ((0, 0), (0, SB * M - n))).reshape(R, M)
        segs.append(seg)
        Ks.append(M // TN)
    big = segs[0] if len(segs) == 1 else jnp.concatenate(segs, axis=1)
    T = sum(Ks)

    buf_kw = {}
    if T >= 8:
        # Spend spare VMEM on pipeline depth (v7x: hides DMA issue latency).
        buf_kw["pipeline_mode"] = pl.Buffered(3)

    out = pl.pallas_call(
        _noobj_bce_block_kernel,
        out_shape=jax.ShapeDtypeStruct((T, R, 1), jnp.float32),
        grid=(T,),
        in_specs=[pl.BlockSpec((R, TN), lambda g: (0, g), **buf_kw)],
        out_specs=pl.BlockSpec((None, R, 1), lambda g: (g, 0, 0)),
        compiler_params=pltpu.CompilerParams(
            dimension_semantics=("parallel",)),
    )(big)

    # Host-side (tiny) re-reduction: per scale, sum its blocks, then fold the
    # SB sub-rows back into per-batch sums.
    sums, off = [], 0
    for K in Ks:
        rows = out[off:off + K, :, 0].sum(axis=0)          # (R,)
        sums.append(rows.reshape(nB, SB).sum(axis=1))      # (nB,)
        off += K
    return sums


def jax_noobj_full_sums(confs):
    """Plain-JAX equivalent of the Pallas kernel (correctness check)."""
    return [_noobj_bce(c).sum(axis=1) for c in confs]


# ----------------------------------------------------------------------------
# Target assignment + forward (glue in plain JAX)
# ----------------------------------------------------------------------------
def bbox_wh_iou(anchor_wh, gwh):
    w1, h1 = anchor_wh[0], anchor_wh[1]
    w2, h2 = gwh[:, 0], gwh[:, 1]
    inter = jnp.minimum(w1, w2) * jnp.minimum(h1, h2)
    union = (w1 * h1 + 1e-16) + w2 * h2 - inter
    return inter / union


def _assign_targets(target, anchors):
    # anchors: (n_scales, nA, 2); target: (nT, 5) = [batch, cx, cy, w, h]
    nA = anchors.shape[1]
    gwh = target[:, 3:5]
    anchors_flat = anchors.reshape(-1, 2)
    ious = jax.vmap(bbox_wh_iou, in_axes=(0, None))(anchors_flat, gwh)  # (S*nA, nT)
    best_flat = jnp.argmax(ious, axis=0)
    return ious, best_flat // nA, best_flat % nA


def loss_layer_forward(xs, target, anchors, noobj_sums_fn=pallas_noobj_full_sums):
    """Forward pass of loss_layer (both populated- and empty-target paths)."""
    nT = target.shape[0]
    nB = xs[0].shape[0]

    # Dense, HBM-bound part: per-batch sum of f(pred_conf) over ALL cells of
    # every scale, in a single fused Pallas call (only pred_conf is streamed).
    confs = [xs_[..., 4].reshape(nB, -1) for xs_ in xs]
    s_all = noobj_sums_fn(confs)                     # list of (nB,) per scale

    zero = jnp.float32(0.0)

    if nT == 0:
        # Empty-target branch of the PyTorch module: tconf == 0 everywhere,
        # loss is noobj_scale * mean(f(pred_conf)) per scale.
        loss_conf = zero
        for i, xs_ in enumerate(xs):
            _, nA, nGh, nGw, _ = xs_.shape
            N = nA * nGh * nGw
            loss_conf = loss_conf + NOOBJ_SCALE * (s_all[i].sum() / (nB * N))
        total_loss = loss_conf
        return total_loss, {"loss": total_loss, "xy": zero, "wh": zero,
                            "conf": loss_conf}

    ious, best_scale, best_anchor = _assign_targets(target, anchors)
    b = target[:, 0].astype(jnp.int32)
    gw_t = target[:, 3]
    gh_t = target[:, 4]
    tidx = jnp.arange(nT)

    loss_xy = zero
    loss_wh = zero
    loss_conf = zero

    for i, xs_ in enumerate(xs):
        _, nA, nGh, nGw, _ = xs_.shape
        N = nA * nGh * nGw
        x = xs_[..., 0]
        y = xs_[..., 1]
        w = xs_[..., 2]
        h = xs_[..., 3]
        pred_conf = xs_[..., 4]

        sel = best_scale == i
        an = best_anchor
        gx = target[:, 1] * nGw
        gy = target[:, 2] * nGh
        gi = jnp.clip(gx.astype(jnp.int32), 0, nGw - 1)
        gj = jnp.clip(gy.astype(jnp.int32), 0, nGh - 1)

        # --- obj-side terms: non-zero only at <= nT target cells (gathers) ---
        # Deduplicate targets landing on the same (b, anchor, gj, gi) cell so
        # the sums match the dense scatter-then-reduce semantics (each obj
        # cell counted once, last write wins).
        cell = ((b * nA + an) * nGh + gj) * nGw + gi
        later_dup = ((cell[None, :] == cell[:, None])
                     & sel[None, :]
                     & (tidx[None, :] > tidx[:, None]))
        winner = (sel & ~later_dup.any(axis=1)).astype(jnp.float32)

        px = x[b, an, gj, gi]
        py = y[b, an, gj, gi]
        pw = w[b, an, gj, gi]
        ph = h[b, an, gj, gi]
        pcf = pred_conf[b, an, gj, gi]

        anc = anchors[i][an]                          # (nT, 2)
        tx_t = gx - jnp.floor(gx)
        ty_t = gy - jnp.floor(gy)
        tw_t = jnp.log(gw_t / anc[:, 0] + 1e-16)
        th_t = jnp.log(gh_t / anc[:, 1] + 1e-16)

        dxy_t = (px - tx_t) ** 2 + (py - ty_t) ** 2
        dwh_t = (pw - tw_t) ** 2 + (ph - th_t) ** 2
        bobj_t = -ALPHA * (1.0 - pcf) ** 2 * jnp.log(pcf + EPS)

        s_dxy = jnp.zeros((nB,), jnp.float32).at[b].add(winner * dxy_t)
        s_dwh = jnp.zeros((nB,), jnp.float32).at[b].add(winner * dwh_t)
        s_bobj = jnp.zeros((nB,), jnp.float32).at[b].add(winner * bobj_t)
        obj_sum = jnp.zeros((nB,), jnp.float32).at[b].add(winner) + 1e-6

        # --- noobj terms: full-grid sum (Pallas) minus gathered corrections
        #     at the cells the reference zeroes in noobj_mask: the obj cells
        #     plus all anchors whose IoU with an assigned target > thres.
        #     noobj_sum = N - #unique zeroed cells (analytic, no dense mask).
        ious_i = ious[i * nA:(i + 1) * nA, :]                 # (nA, nT)
        ign_valid = sel[:, None] & (ious_i.T > IGNORE_THRES)  # (nT, nA)
        aa = jnp.broadcast_to(jnp.arange(nA)[None, :], (nT, nA))

        cand_a = jnp.concatenate([an[:, None], aa], axis=1).reshape(-1)
        cand_ok = jnp.concatenate([sel[:, None], ign_valid], axis=1).reshape(-1)
        cand_b = jnp.broadcast_to(b[:, None], (nT, nA + 1)).reshape(-1)
        cand_gj = jnp.broadcast_to(gj[:, None], (nT, nA + 1)).reshape(-1)
        cand_gi = jnp.broadcast_to(gi[:, None], (nT, nA + 1)).reshape(-1)

        M = nT * (nA + 1)
        midx = jnp.arange(M)
        key = ((cand_b * nA + cand_a) * nGh + cand_gj) * nGw + cand_gi
        key = jnp.where(cand_ok, key, nB * N + midx)  # unique inert sentinels
        dup_earlier = ((key[None, :] == key[:, None])
                       & (midx[None, :] < midx[:, None]))
        zwin = (cand_ok & ~dup_earlier.any(axis=1)).astype(jnp.float32)

        pc_c = pred_conf[cand_b, cand_a, cand_gj, cand_gi]
        f_c = _noobj_bce(pc_c)

        corr_bce = jnp.zeros((nB,), jnp.float32).at[cand_b].add(zwin * f_c)
        zero_cnt = jnp.zeros((nB,), jnp.float32).at[cand_b].add(zwin)

        s_bnoobj = s_all[i] - corr_bce
        noobj_sum = (jnp.float32(N) - zero_cnt) + 1e-6

        loss_xy = loss_xy + jnp.mean(s_dxy / obj_sum)
        loss_wh = loss_wh + jnp.mean(s_dwh / obj_sum)
        loss_conf = (loss_conf
                     + OBJ_SCALE * jnp.mean(s_bobj / obj_sum)
                     + NOOBJ_SCALE * jnp.mean(s_bnoobj / noobj_sum))

    total_loss = loss_xy + loss_wh + loss_conf
    # JAX scalars (no host sync) so the forward stays jit/grad compatible.
    metrics = {"loss": total_loss, "xy": loss_xy, "wh": loss_wh,
               "conf": loss_conf}
    return total_loss, metrics


# ----------------------------------------------------------------------------
# Dense pure-JAX reference mirroring the PyTorch module (for the self-check)
# ----------------------------------------------------------------------------
def dense_loss_reference(xs, target, anchors):
    nT = target.shape[0]
    ious, best_scale, best_anchor = _assign_targets(target, anchors)
    b = target[:, 0].astype(jnp.int32)
    loss_xy = loss_wh = loss_conf = jnp.float32(0.0)
    for i, xs_ in enumerate(xs):
        nB, nA, nGh, nGw, _ = xs_.shape
        x, y, w, h, pc = (xs_[..., j] for j in range(5))
        sel = best_scale == i
        an = best_anchor
        gx = target[:, 1] * nGw
        gy = target[:, 2] * nGh
        gi = jnp.clip(gx.astype(jnp.int32), 0, nGw - 1)
        gj = jnp.clip(gy.astype(jnp.int32), 0, nGh - 1)
        b_drop = jnp.where(sel, b, nB)
        shape = (nB, nA, nGh, nGw)
        obj = jnp.zeros(shape, jnp.float32).at[b_drop, an, gj, gi].set(
            1.0, mode="drop")
        noobj = jnp.ones(shape, jnp.float32).at[b_drop, an, gj, gi].set(
            0.0, mode="drop")
        ign = ious[i * nA:(i + 1) * nA, :].T > IGNORE_THRES
        bb = jnp.where(sel[:, None] & ign, b[:, None], nB)
        aa = jnp.broadcast_to(jnp.arange(nA)[None, :], (nT, nA))
        noobj = noobj.at[bb, aa, gj[:, None], gi[:, None]].set(0.0, mode="drop")
        anc = anchors[i][an]
        tx = jnp.zeros(shape, jnp.float32).at[b_drop, an, gj, gi].set(
            gx - jnp.floor(gx), mode="drop")
        ty = jnp.zeros(shape, jnp.float32).at[b_drop, an, gj, gi].set(
            gy - jnp.floor(gy), mode="drop")
        tw = jnp.zeros(shape, jnp.float32).at[b_drop, an, gj, gi].set(
            jnp.log(target[:, 3] / anc[:, 0] + 1e-16), mode="drop")
        th = jnp.zeros(shape, jnp.float32).at[b_drop, an, gj, gi].set(
            jnp.log(target[:, 4] / anc[:, 1] + 1e-16), mode="drop")
        ax = (1, 2, 3)
        obj_sum = obj.sum(ax) + 1e-6
        noobj_sum = noobj.sum(ax) + 1e-6
        dxy = (x - tx) ** 2 + (y - ty) ** 2
        dwh = (w - tw) ** 2 + (h - th) ** 2
        bce = (-ALPHA * obj * (1.0 - pc) ** 2 * jnp.log(pc + EPS)
               - (1.0 - ALPHA) * (1.0 - obj) * pc ** 2 * jnp.log(1.0 - pc + EPS))
        loss_xy += ((dxy * obj).sum(ax) / obj_sum).mean()
        loss_wh += ((dwh * obj).sum(ax) / obj_sum).mean()
        loss_conf += (OBJ_SCALE * ((bce * obj).sum(ax) / obj_sum).mean()
                      + NOOBJ_SCALE * ((bce * noobj).sum(ax) / noobj_sum).mean())
    return loss_xy + loss_wh + loss_conf


# ----------------------------------------------------------------------------
if __name__ == "__main__":
    key = jax.random.PRNGKey(0)
    nB, nA, nT = 2, 3, 4

    anchors = jnp.array([[[0.10, 0.13], [0.22, 0.28], [0.35, 0.45]],
                         [[0.45, 0.35], [0.60, 0.62], [0.85, 0.80]]],
                        dtype=jnp.float32)

    k1, k2 = jax.random.split(key)
    xs0 = jax.nn.sigmoid(jax.random.normal(k1, (nB, nA, 16, 16, 5),
                                           dtype=jnp.float32))
    xs1 = jax.nn.sigmoid(jax.random.normal(k2, (nB, nA, 8, 8, 5),
                                           dtype=jnp.float32))

    # Deterministic targets [batch, cx, cy, w, h]; distinct grid cells on both
    # scales so the duplicate-cell tie-break cannot affect the self-check.
    target = jnp.array([[0.0, 0.10, 0.15, 0.08, 0.10],
                        [1.0, 0.35, 0.40, 0.20, 0.25],
                        [0.0, 0.60, 0.22, 0.50, 0.55],
                        [1.0, 0.85, 0.70, 0.30, 0.80]], dtype=jnp.float32)

    fwd_pallas = jax.jit(lambda xs, t, a: loss_layer_forward(
        xs, t, a, noobj_sums_fn=pallas_noobj_full_sums))
    total_pallas, metrics = fwd_pallas([xs0, xs1], target, anchors)
    total_pallas = jax.block_until_ready(total_pallas)

    # Check 1: Pallas kernel vs plain-JAX reduction (identical glue code).
    total_jaxsum, _ = loss_layer_forward([xs0, xs1], target, anchors,
                                         noobj_sums_fn=jax_noobj_full_sums)
    # Check 2: whole forward vs dense PyTorch-style reference.
    total_dense = dense_loss_reference([xs0, xs1], target, anchors)
    total_jaxsum = jax.block_until_ready(total_jaxsum)
    total_dense = jax.block_until_ready(total_dense)

    assert jnp.allclose(total_pallas, total_jaxsum, rtol=1e-4, atol=1e-4), (
        total_pallas, total_jaxsum)
    assert jnp.allclose(total_pallas, total_dense, rtol=1e-4, atol=1e-4), (
        total_pallas, total_dense)

    # Check 3: empty-target branch (noobj-only loss over every cell).
    total_empty, _ = loss_layer_forward([xs0, xs1],
                                        jnp.zeros((0, 5), jnp.float32),
                                        anchors)
    ref_empty = sum(NOOBJ_SCALE * jnp.mean(_noobj_bce(c))
                    for c in (xs0[..., 4], xs1[..., 4]))
    total_empty = jax.block_until_ready(total_empty)
    assert jnp.allclose(total_empty, ref_empty, rtol=1e-4, atol=1e-4), (
        total_empty, ref_empty)

    print("KERNEL_OK")
</pallas_src>

<mosaic_0001>
module attributes {stable_mosaic.version = 11 : i64} {
  func.func private @main(%arg0: i32) attributes {dimension_semantics = [#tpu.dimension_semantics<core_parallel>], iteration_bounds = array<i64: 2>, tpu.core_type = #tpu.core_type<sc_scalar_subcore>, window_params = []} {
    return
  }
}

module attributes {stable_mosaic.version = 11 : i64} {
  func.func private @main(%arg0: i32) attributes {dimension_semantics = [#tpu.dimension_semantics<core_parallel>], iteration_bounds = array<i64: 2>, tpu.core_type = #tpu.core_type<sc_scalar_subcore>, window_params = []} {
    return
  }
}

module attributes {stable_mosaic.version = 11 : i64} {
  func.func @_noobj_bce_block_kernel(%arg0: i32, %arg1: memref<8x128xf32, #tpu.memory_space<vmem>>, %arg2: memref<1x8x1xf32, #tpu.memory_space<vmem>>) attributes {dimension_semantics = [#tpu.dimension_semantics<parallel>], iteration_bounds = array<i64: 3>, scalar_prefetch = 0 : i64, scratch_operands = 0 : i64, tpu.core_type = #tpu.core_type<tc>, window_params = [{transform_indices = @transform_0, window_bounds = array<i64: 8, 128>}, {transform_indices = @transform_1, window_bounds = array<i64: 1, 8, 1>}]} {
    %c0 = arith.constant 0 : index
    %c0_0 = arith.constant 0 : index
    %0 = vector.load %arg1[%c0, %c0_0] : memref<8x128xf32, #tpu.memory_space<vmem>>, vector<8x128xf32>
    %cst = arith.constant -7.500000e-01 : f32
    %1 = vector.broadcast %cst : f32 to vector<8x128xf32>
    %2 = arith.mulf %1, %0 : vector<8x128xf32>
    %3 = arith.mulf %2, %0 : vector<8x128xf32>
    %cst_1 = arith.constant 1.000000e+00 : f32
    %4 = vector.broadcast %cst_1 : f32 to vector<8x128xf32>
    %5 = arith.subf %4, %0 : vector<8x128xf32>
    %cst_2 = arith.constant 1.000000e-16 : f32
    %6 = vector.broadcast %cst_2 : f32 to vector<8x128xf32>
    %7 = arith.addf %5, %6 : vector<8x128xf32>
    %8 = math.log %7 : vector<8x128xf32>
    %9 = arith.mulf %3, %8 : vector<8x128xf32>
    %cst_3 = arith.constant dense<0.000000e+00> : vector<8xf32>
    %10 = vector.multi_reduction <add>, %9, %cst_3 [1] : vector<8x128xf32> to vector<8xf32>
    %11 = vector.shape_cast %10 : vector<8xf32> to vector<8x1xf32>
    %c0_4 = arith.constant 0 : index
    %c0_5 = arith.constant 0 : index
    %c0_6 = arith.constant 0 : index
    %12 = vector.load %arg2[%c0_4, %c0_5, %c0_6] : memref<1x8x1xf32, #tpu.memory_space<vmem>>, vector<1x8x1xf32>
    %13 = vector.shape_cast %12 : vector<1x8x1xf32> to vector<8x1xf32>
    %14 = vector.shape_cast %11 : vector<8x1xf32> to vector<1x8x1xf32>
    tpu.vector_store %arg2[%c0_4, %c0_5, %c0_6], %14 {strides = array<i32>} : memref<1x8x1xf32, #tpu.memory_space<vmem>>, vector<1x8x1xf32>,
    return
  }
  func.func @transform_0(%arg0: i32) -> (i32, i32) {
    %c0_i32 = arith.constant 0 : i32
    %c0_i32_0 = arith.constant 0 : i32
    return %c0_i32, %arg0 : i32, i32
  }
  func.func @transform_1(%arg0: i32) -> (i32, i32, i32) {
    %c0_i32 = arith.constant 0 : i32
    %c0_i32_0 = arith.constant 0 : i32
    %c0_i32_1 = arith.constant 0 : i32
    return %arg0, %c0_i32, %c0_i32_0 : i32, i32, i32
  }
}

</mosaic_0001>

<bundles_post_ra>
// kernel: mul.34
= control target key start
LH: loop header
LB: loop body
LE: loop exit
PB: predicated region body
PF: predicated region fallthrough
CT: control target
= control target key end

     0   :  { %s34_s0 = inlined_call_operand.vmem [shape: f32[4], index: 0, kind: input, shape index: {}]   ;;  %s35_s1 = inlined_call_operand.vmem [shape: f32[4], index: 1, kind: input, shape index: {}]   ;;  %s36_s2 = inlined_call_operand.vmem [shape: f32[4], index: 2, kind: output, shape index: {}]  }
   0x1   :  { %v3_v0 = vld [vmem:[%s34_s0] sm:$0x1] }
   0x2   :  { %v4_v1 = vld [vmem:[%s35_s1] sm:$0x1] }
   0x3   :  { %v7_v2 = vmul.f32 %v4_v1, %v3_v0 }
   0x5   :  { %9 = vst [vmem:[%s36_s2] sm:$0x1] %v7_v2 }

// kernel: squeeze.34
= control target key start
LH: loop header
LB: loop body
LE: loop exit
PB: predicated region body
PF: predicated region fallthrough
CT: control target
= control target key end

     0   :  { %s13_s6 = smov 3  ;;  %s27_s9 = smov 3  ;;  %vm74_vm0 = vcmask 1043458   ;;  %vm4_vm1 = vcmask 64512   ;;  %vm17_vm2 = vcmask 1048512   ;;  %vm24_vm3 = vcmask 982912   ;;  %s329_s0 = inlined_call_operand.vmem [shape: f32[2,3,8,8,1], index: 0, kind: input, shape index: {}]   ;;  %s330_s1 = inlined_call_operand.vmem [shape: f32[2,192], index: 1, kind: output, shape index: {}]  }
   0x1   :  { %v181_v0 = vld [vmem:[%s329_s0 + $0xf] ss:$24 sm:%s13_s6]   ;;  %s219_s10 = smov 120   ;;  %v183_v1 = vld [vmem:[%s329_s0 + $0xd] ss:$24 sm:%s27_s9]   ;;  %s20_s13 = smov 3 }
   0x2   :  { %15 = vrot.lane.b32.xlu0 %v181_v0, %s219_s10  ;;  %s220_s14 = smov 104   ;;  %v182_v2 = vld [vmem:[%s329_s0 + $0xe] ss:$24 sm:%s20_s13]   ;;  %s34_s17 = smov 3  ;;  %vm31_vm4 = vcmask 917312   ;;  %vm38_vm5 = vcmask 851712  }
   0x3   :  { %29 = vrot.lane.b32.xlu1 %v183_v1, %s220_s14  ;;  %v184_v3 = vld [vmem:[%s329_s0 + $0xc] ss:$24 sm:%s34_s17]   ;;  %s41_s20 = smov 3  ;;  %s48_s21 = smov 3  ;;  %vm45_vm6 = vcmask 786112   ;;  %vm52_vm7 = vcmask 720512  }
   0x4   :  { %s221_s22 = smov 112   ;;  %s222_s23 = smov 96   ;;  %v185_v4 = vld [vmem:[%s329_s0 + $0xb] ss:$24 sm:%s41_s20]   ;;  %v186_v5 = vld [vmem:[%s329_s0 + $0xa] ss:$24 sm:%s48_s21]  }
   0x5   :  { %s55_s26 = smov 3  ;;  %s62_s29 = smov 3  ;;  %vm59_vm8 = vcmask 654912   ;;  %vm66_vm9 = vcmask 589312   ;;  %vm78_vm10 = vcmask 523712   ;;  %vm92_vm11 = vcmask 458112  }
   0x6   :  { %22 = vrot.lane.b32.xlu0 %v182_v2, %s221_s22  ;;  %s69_s30 = smov 3  ;;  %s72_s2 = smov 12  ;;  %v187_v6 = vld [vmem:[%s329_s0 + $0x9] ss:$24 sm:%s55_s26]   ;;  %vm106_vm12 = vcmask 392512   ;;  %vm120_vm13 = vcmask 326912  }
   0x7   :  { %36 = vrot.lane.b32.xlu1 %v184_v3, %s222_s23  ;;  %s223_s3 = smov 88   ;;  %s83_s6 = smov 3  ;;  %v188_v7 = vld [vmem:[%s329_s0 + $0x8] ss:$24 sm:%s62_s29]   ;;  %vm134_vm14 = vcmask 261312   ;;  %vm148_vm15 = vcmask 195712  }
   0x8   :  { %s86_s7 = smov 12  ;;  %s224_s8 = smov 80   ;;  %v189_v8 = vld [vmem:[%s329_s0 + $0x7] ss:$24 sm:%s69_s30]   ;;  %v191_v10 = vld [vmem:[%s329_s0 + $0x6] ss:$24 sm:%s83_s6]  }
   0x9   :  { %v190_v9 = vld [vmem:[%s329_s0 - $0x19] ss:$24 sm:%s72_s2]   ;;  %v192_v11 = vld [vmem:[%s329_s0 - $0x1a] ss:$24 sm:%s86_s7]   ;;  %s97_s19 = smov 3  ;;  %s100_s20 = smov 12 }
   0xa   :  { %43 = vrot.lane.b32.xlu0 %v185_v4, %s223_s3  ;;  %s225_s21 = smov 72   ;;  %s111_s22 = smov 3  ;;  %v75_v12 = vsel %vm74_vm0, %v190_v9, %v189_v8  ;;  %v89_v13 = vsel %vm74_vm0, %v192_v11, %v191_v10  ;;  %v193_v14 = vld [vmem:[%s329_s0 + $0x5] ss:$24 sm:%s97_s19]  }
   0xb   :  { %50 = vrot.lane.b32.xlu1 %v186_v5, %s224_s8  ;;  %s114_s23 = smov 12  ;;  %s226_s24 = smov 64   ;;  %v194_v15 = vld [vmem:[%s329_s0 - $0x1b] ss:$24 sm:%s100_s20]  }
   0xc   :  { %s125_s25 = smov 3  ;;  %s128_s30 = smov 12  ;;  %v195_v16 = vld [vmem:[%s329_s0 + $0x4] ss:$24 sm:%s111_s22]   ;;  %v103_v19 = vsel %vm74_vm0, %v194_v15, %v193_v14 }
   0xd   :  { %v196_v17 = vld [vmem:[%s329_s0 - $0x1c] ss:$24 sm:%s114_s23]   ;;  %s139_s6 = smov 3  ;;  %s227_s7 = smov 56   ;;  %v197_v18 = vld [vmem:[%s329_s0 + $0x3] ss:$24 sm:%s125_s25]  }
   0xe   :  { %57 = vrot.lane.b32.xlu0 %v187_v6, %s225_s21  ;;  %s142_s10 = smov 12  ;;  %s2_s11 = smov 3  ;;  %v198_v20 = vld [vmem:[%s329_s0 - $0x1d] ss:$24 sm:%s128_s30]   ;;  %v117_v21 = vsel %vm74_vm0, %v196_v17, %v195_v16 }
   0xf   :  { %64 = vrot.lane.b32.xlu1 %v188_v7, %s226_s24  ;;  %s228_s12 = smov 48   ;;  %s7_s15 = smov 3  ;;  %v3_v22 = vld [vmem:[%s329_s0] ss:$16 sm:%s2_s11]   ;;  %v131_v26 = vsel %vm74_vm0, %v198_v20, %v197_v18 }
  0x10   :  { %v180_v23 = vld [vmem:[%s329_s0 + $0x18] ss:$16 sm:%s7_s15]   ;;  %v199_v24 = vld [vmem:[%s329_s0 + $0x2] ss:$24 sm:%s139_s6]   ;;  %s153_s24 = smov 3  ;;  %s156_s25 = smov 12 }
  0x11   :  { %v200_v25 = vld [vmem:[%s329_s0 - $0x1e] ss:$24 sm:%s142_s10]   ;;  %5 = vst.msk [vmem:[#allocation0] ss:$8 sm:$0x3] %vm4_vm1, %v3_v22   ;;  %s229_s26 = smov 40  }
  0x12   :  { %76 = vrot.lane.b32.xlu0 %v75_v12, %s227_s7  ;;  %11 = vst.msk [vmem:[#allocation0 + $0x1] ss:$8 sm:$0x3] %vm4_vm1, %v180_v23   ;;  %s230_s27 = smov 32   ;;  %v145_v27 = vsel %vm74_vm0, %v200_v25, %v199_v24  ;;  %v201_v28 = vld [vmem:[%s329_s0 + $0x1] ss:$24 sm:%s153_s24]  }
  0x13   :  { %90 = vrot.lane.b32.xlu1 %v89_v13, %s228_s12  ;;  %v202_v29 = vld [vmem:[%s329_s0 - $0x1f] ss:$24 sm:%s156_s25]   ;;  %s231_s0 = smov 24   ;;  %s232_s3 = smov 16  }
  0x14   :  { %v159_v30 = vsel %vm74_vm0, %v202_v29, %v201_v28  ;;  %s233_s4 = smov 8   ;;  %vm162_vm0 = vcmask 130112  }
  0x16   :  { %104 = vrot.lane.b32.xlu0 %v103_v19, %s229_s26 }
  0x17   :  { %118 = vrot.lane.b32.xlu1 %v117_v21, %s230_s27 }
  0x1a   :  { %132 = vrot.lane.b32.xlu0 %v131_v26, %s231_s0 }
  0x1b   :  { %146 = vrot.lane.b32.xlu1 %v145_v27, %s232_s3 }
  0x1e   :  { %160 = vrot.lane.b32.xlu0 %v159_v30, %s233_s4 }
  0x74   :  { %v16_v31 = vpop.permute.xlu0 %15  }
  0x75   :  { %18 = vst.msk [vmem:[#allocation0] sm:$0x3] %vm17_vm2, %v16_v31   ;;  %v30_v32 = vpop.permute.xlu1 %29  }
  0x78   :  { %v23_v33 = vpop.permute.xlu0 %22  }
  0x79   :  { %25 = vst.msk [vmem:[#allocation0] sm:$0x3] %vm24_vm3, %v23_v33   ;;  %v37_v34 = vpop.permute.xlu1 %36  }
  0x7a   :  { %32 = vst.msk [vmem:[#allocation0] sm:$0x3] %vm31_vm4, %v30_v32  }
  0x7b   :  { %39 = vst.msk [vmem:[#allocation0] sm:$0x3] %vm38_vm5, %v37_v34  }
  0x7c   :  { %v44_v35 = vpop.permute.xlu0 %43  }
  0x7d   :  { %46 = vst.msk [vmem:[#allocation0] sm:$0x3] %vm45_vm6, %v44_v35   ;;  %v51_v36 = vpop.permute.xlu1 %50  }
  0x7e   :  { %53 = vst.msk [vmem:[#allocation0] sm:$0x3] %vm52_vm7, %v51_v36  }
  0x80   :  { %v58_v37 = vpop.permute.xlu0 %57  }
  0x81   :  { %60 = vst.msk [vmem:[#allocation0] sm:$0x3] %vm59_vm8, %v58_v37   ;;  %v65_v38 = vpop.permute.xlu1 %64  }
  0x82   :  { %67 = vst.msk [vmem:[#allocation0] sm:$0x3] %vm66_vm9, %v65_v38  }
  0x84   :  { %v77_v39 = vpop.permute.xlu0 %76  }
  0x85   :  { %79 = vst.msk [vmem:[#allocation0] sm:$0x3] %vm78_vm10, %v77_v39   ;;  %81 = vst.msk [vmem:[#allocation0 + $0x6] sm:$0xc] %vm78_vm10, %v77_v39   ;;  %v91_v40 = vpop.permute.xlu1 %90  }
  0x86   :  { %93 = vst.msk [vmem:[#allocation0] sm:$0x3] %vm92_vm11, %v91_v40   ;;  %95 = vst.msk [vmem:[#allocation0 + $0x6] sm:$0xc] %vm92_vm11, %v91_v40  }
  0x88   :  { %v105_v41 = vpop.permute.xlu0 %104  }
  0x89   :  { %107 = vst.msk [vmem:[#allocation0] sm:$0x3] %vm106_vm12, %v105_v41   ;;  %109 = vst.msk [vmem:[#allocation0 + $0x6] sm:$0xc] %vm106_vm12, %v105_v41   ;;  %v119_v42 = vpop.permute.xlu1 %118  }
  0x8a   :  { %121 = vst.msk [vmem:[#allocation0] sm:$0x3] %vm120_vm13, %v119_v42   ;;  %123 = vst.msk [vmem:[#allocation0 + $0x6] sm:$0xc] %vm120_vm13, %v119_v42  }
  0x8c   :  { %v133_v43 = vpop.permute.xlu0 %132  }
  0x8d   :  { %135 = vst.msk [vmem:[#allocation0] sm:$0x3] %vm134_vm14, %v133_v43   ;;  %137 = vst.msk [vmem:[#allocation0 + $0x6] sm:$0xc] %vm134_vm14, %v133_v43   ;;  %v147_v44 = vpop.permute.xlu1 %146  }
  0x8e   :  { %149 = vst.msk [vmem:[#allocation0] sm:$0x3] %vm148_vm15, %v147_v44   ;;  %151 = vst.msk [vmem:[#allocation0 + $0x6] sm:$0xc] %vm148_vm15, %v147_v44  }
  0x90   :  { %v161_v45 = vpop.permute.xlu0 %160  }
  0x91   :  { %163 = vst.msk [vmem:[#allocation0] sm:$0x3] %vm162_vm0, %v161_v45   ;;  %165 = vst.msk [vmem:[#allocation0 + $0x6] sm:$0xc] %vm162_vm0, %v161_v45  }
  0x98   :  { %v170_v46 = vld [vmem:[#allocation0] sm:$0x3]  ;;  %v175_v47 = vld [vmem:[#allocation0 + $0x8] sm:$0x3] }
  0x99   :  { %173 = vst [vmem:[%s330_s1] sm:$0x3] %v170_v46  ;;  %203 = vst [vmem:[%s330_s1 + $0x2] sm:$0x3] %v175_v47 }

// kernel: squeeze.33
= control target key start
LH: loop header
LB: loop body
LE: loop exit
PB: predicated region body
PF: predicated region fallthrough
CT: control target
= control target key end

     0   :  { %vm22_vm0 = vcmask 1043458   ;;  %s88_s6 = smov 3  ;;  %s91_s9 = smov 12  ;;  %vm27_vm1 = vcmask 1045508   ;;  %vm32_vm2 = vcmask 1047558   ;;  %vm4_vm3 = vcmask 1047556   ;;  %s635_s0 = inlined_call_operand.vmem [shape: f32[2,3,16,16,1], index: 0, kind: input, shape index: {}]   ;;  %s636_s1 = inlined_call_operand.vmem [shape: f32[2,768], index: 1, kind: output, shape index: {}]  }
   0x1   :  { %v374_v0 = vld [vmem:[%s635_s0 + $0x26] ss:$48 sm:%s88_s6]   ;;  %v375_v1 = vld [vmem:[%s635_s0 - $0x32] ss:$48 sm:%s91_s9]   ;;  %s45_s12 = smov 3  ;;  %s48_s13 = smov 12 }
   0x2   :  { %v94_v2 = vsel %vm22_vm0, %v375_v1, %v374_v0  ;;  %v368_v3 = vld [vmem:[%s635_s0 + $0x27] ss:$48 sm:%s45_s12]   ;;  %v369_v4 = vld [vmem:[%s635_s0 - $0x31] ss:$48 sm:%s48_s13]   ;;  %s60_s18 = smov 3  ;;  %s63_s19 = smov 12 }
   0x3   :  { %s418_s20 = smov 96   ;;  %v51_v5 = vsel %vm22_vm0, %v369_v4, %v368_v3  ;;  %v370_v6 = vld [vmem:[%s635_s0 + $0x6] ss:$48 sm:%s60_s18]   ;;  %s68_s23 = smov 48  ;;  %v371_v7 = vld [vmem:[%s635_s0 - $0x52] ss:$48 sm:%s63_s19]  }
   0x4   :  { %95 = vrot.lane.b32.xlu1 %v94_v2, %s418_s20  ;;  %s73_s24 = smov 192  ;;  %s419_s25 = smov 112   ;;  %v66_v8 = vsel %vm22_vm0, %v371_v7, %v370_v6  ;;  %v372_v9 = vld [vmem:[%s635_s0 - $0xaa] ss:$48 sm:%s68_s23]   ;;  %vm6_vm4 = vcmask 130048   ;;  %vm36_vm5 = vcmask 1048448  }
   0x5   :  { %52 = vrot.lane.b32.xlu0 %v51_v5, %s419_s25  ;;  %s17_s28 = smov 3  ;;  %s20_s29 = smov 12  ;;  %v373_v10 = vld [vmem:[%s635_s0 - $0x102] ss:$48 sm:%s73_s24]   ;;  %v71_v11 = vsel %vm27_vm1, %v372_v9, %v66_v8  ;;  %vm79_vm6 = vcmask 917248   ;;  %vm122_vm7 = vcmask 786048  }
   0x6   :  { %s25_s5 = smov 48  ;;  %s30_s6 = smov 192  ;;  %v364_v12 = vld [vmem:[%s635_s0 + $0x7] ss:$48 sm:%s17_s28]   ;;  %v365_v13 = vld [vmem:[%s635_s0 - $0x51] ss:$48 sm:%s20_s29]   ;;  %v76_v14 = vsel %vm32_vm2, %v373_v10, %v71_v11 }
   0x7   :  { %s131_s11 = smov 3  ;;  %v23_v15 = vsel %vm22_vm0, %v365_v13, %v364_v12  ;;  %v366_v16 = vld [vmem:[%s635_s0 - $0xa9] ss:$48 sm:%s25_s5]   ;;  %v367_v17 = vld [vmem:[%s635_s0 - $0x101] ss:$48 sm:%s30_s6]   ;;  %s134_s16 = smov 12 }
   0x8   :  { %s103_s17 = smov 3  ;;  %77 = vrot.lane.b32.xlu1 %v76_v14, %s418_s20  ;;  %v28_v18 = vsel %vm27_vm1, %v366_v16, %v23_v15  ;;  %v380_v19 = vld [vmem:[%s635_s0 + $0x25] ss:$48 sm:%s131_s11]   ;;  %s106_s20 = smov 12  ;;  %vm165_vm8 = vcmask 654848   ;;  %vm208_vm9 = vcmask 523648  }
   0x9   :  { %s111_s21 = smov 48  ;;  %v33_v20 = vsel %vm32_vm2, %v367_v17, %v28_v18  ;;  %v381_v21 = vld [vmem:[%s635_s0 - $0x33] ss:$48 sm:%s134_s16]   ;;  %v376_v22 = vld [vmem:[%s635_s0 + $0x5] ss:$48 sm:%s103_s17]   ;;  %s116_s27 = smov 192 }
   0xa   :  { %34 = vrot.lane.b32.xlu0 %v33_v20, %s419_s25  ;;  %v137_v23 = vsel %vm22_vm0, %v381_v21, %v380_v19  ;;  %v377_v24 = vld [vmem:[%s635_s0 - $0x53] ss:$48 sm:%s106_s20]   ;;  %s174_s29 = smov 3  ;;  %s177_s30 = smov 12  ;;  %vm251_vm10 = vcmask 392448   ;;  %vm294_vm11 = vcmask 261248  }
   0xb   :  { %v109_v25 = vsel %vm22_vm0, %v377_v24, %v376_v22  ;;  %v378_v26 = vld [vmem:[%s635_s0 - $0xab] ss:$48 sm:%s111_s21]   ;;  %v379_v27 = vld [vmem:[%s635_s0 - $0x103] ss:$48 sm:%s116_s27]   ;;  %s146_s6 = smov 3  ;;  %s149_s7 = smov 12 }
   0xc   :  { %s420_s8 = smov 80   ;;  %v114_v28 = vsel %vm27_vm1, %v378_v26, %v109_v25  ;;  %v386_v29 = vld [vmem:[%s635_s0 + $0x24] ss:$48 sm:%s174_s29]   ;;  %s154_s11 = smov 48  ;;  %v387_v31 = vld [vmem:[%s635_s0 - $0x34] ss:$48 sm:%s177_s30]  }
   0xd   :  { %138 = vrot.lane.b32.xlu1 %v137_v23, %s420_s8  ;;  %s159_s12 = smov 192  ;;  %v119_v30 = vsel %vm32_vm2, %v379_v27, %v114_v28  ;;  %v382_v32 = vld [vmem:[%s635_s0 + $0x4] ss:$48 sm:%s146_s6]   ;;  %s217_s17 = smov 3  ;;  %v180_v33 = vsel %vm22_vm0, %v387_v31, %v386_v29 }
   0xe   :  { %120 = vrot.lane.b32.xlu0 %v119_v30, %s420_s8  ;;  %v383_v34 = vld [vmem:[%s635_s0 - $0x54] ss:$48 sm:%s149_s7]   ;;  %s220_s20 = smov 12  ;;  %s189_s21 = smov 3 }
   0xf   :  { %v152_v35 = vsel %vm22_vm0, %v383_v34, %v382_v32  ;;  %v384_v36 = vld [vmem:[%s635_s0 - $0xac] ss:$48 sm:%s154_s11]   ;;  %v385_v37 = vld [vmem:[%s635_s0 - $0x104] ss:$48 sm:%s159_s12]   ;;  %s192_s27 = smov 12  ;;  %s421_s25 = smov 64  }
  0x10   :  { %v157_v38 = vsel %vm27_vm1, %v384_v36, %v152_v35  ;;  %v392_v39 = vld [vmem:[%s635_s0 + $0x23] ss:$48 sm:%s217_s17]   ;;  %s197_s30 = smov 48  ;;  %s202_s2 = smov 192  ;;  %v393_v41 = vld [vmem:[%s635_s0 - $0x35] ss:$48 sm:%s220_s20]  }
  0x11   :  { %181 = vrot.lane.b32.xlu1 %v180_v33, %s421_s25  ;;  %v162_v40 = vsel %vm32_vm2, %v385_v37, %v157_v38  ;;  %v388_v42 = vld [vmem:[%s635_s0 + $0x3] ss:$48 sm:%s189_s21]   ;;  %s260_s7 = smov 3  ;;  %v223_v43 = vsel %vm22_vm0, %v393_v41, %v392_v39  ;;  %s263_s10 = smov 12 }
  0x12   :  { %163 = vrot.lane.b32.xlu0 %v162_v40, %s421_s25  ;;  %v389_v44 = vld [vmem:[%s635_s0 - $0x55] ss:$48 sm:%s192_s27]   ;;  %s232_s11 = smov 3  ;;  %s235_s16 = smov 12 }
  0x13   :  { %v195_v45 = vsel %vm22_vm0, %v389_v44, %v388_v42  ;;  %v390_v46 = vld [vmem:[%s635_s0 - $0xad] ss:$48 sm:%s197_s30]   ;;  %v391_v47 = vld [vmem:[%s635_s0 - $0x105] ss:$48 sm:%s202_s2]   ;;  %s422_s17 = smov 48   ;;  %s240_s20 = smov 48 }
  0x14   :  { %v200_v48 = vsel %vm27_vm1, %v390_v46, %v195_v45  ;;  %v398_v49 = vld [vmem:[%s635_s0 + $0x22] ss:$48 sm:%s260_s7]   ;;  %s245_s21 = smov 192  ;;  %v399_v51 = vld [vmem:[%s635_s0 - $0x36] ss:$48 sm:%s263_s10]   ;;  %s303_s27 = smov 3 }
  0x15   :  { %224 = vrot.lane.b32.xlu1 %v223_v43, %s422_s17  ;;  %v205_v50 = vsel %vm32_vm2, %v391_v47, %v200_v48  ;;  %v394_v52 = vld [vmem:[%s635_s0 + $0x2] ss:$48 sm:%s232_s11]   ;;  %v266_v53 = vsel %vm22_vm0, %v399_v51, %v398_v49  ;;  %s306_s29 = smov 12  ;;  %s275_s30 = smov 3 }
  0x16   :  { %206 = vrot.lane.b32.xlu0 %v205_v50, %s422_s17  ;;  %v395_v54 = vld [vmem:[%s635_s0 - $0x56] ss:$48 sm:%s235_s16]   ;;  %s278_s6 = smov 12  ;;  %s283_s7 = smov 48 }
  0x17   :  { %v238_v55 = vsel %vm22_vm0, %v395_v54, %v394_v52  ;;  %v396_v56 = vld [vmem:[%s635_s0 - $0xae] ss:$48 sm:%s240_s20]   ;;  %v397_v57 = vld [vmem:[%s635_s0 - $0x106] ss:$48 sm:%s245_s21]   ;;  %s423_s8 = smov 32   ;;  %s288_s11 = smov 192 }
  0x18   :  { %v243_v58 = vsel %vm27_vm1, %v396_v56, %v238_v55  ;;  %v404_v59 = vld [vmem:[%s635_s0 + $0x21] ss:$48 sm:%s303_s27]   ;;  %v2_v60 = vld [vmem:[%s635_s0] ss:$8 sm:$0xf]   ;;  %s424_s27 = smov 16  }
  0x19   :  { %267 = vrot.lane.b32.xlu1 %v266_v53, %s423_s8  ;;  %v248_v61 = vsel %vm32_vm2, %v397_v57, %v243_v58  ;;  %v405_v62 = vld [vmem:[%s635_s0 - $0x37] ss:$48 sm:%s306_s29]   ;;  %v3_v2 = vld [vmem:[%s635_s0] ss:$8 sm:$0xf0]  }
  0x1a   :  { %v400_v63 = vld [vmem:[%s635_s0 + $0x1] ss:$48 sm:%s275_s30]   ;;  %249 = vrot.lane.b32.xlu0 %v248_v61, %s423_s8  ;;  %v309_v0 = vsel %vm22_vm0, %v405_v62, %v404_v59  ;;  %v5_v6 = vsel %vm4_vm3, %v3_v2, %v2_v60  ;;  %v363_v8 = vld [vmem:[%s635_s0 + $0x40] ss:$8 sm:$0xf]  }
  0x1b   :  { %v401_v1 = vld [vmem:[%s635_s0 - $0x57] ss:$48 sm:%s278_s6]   ;;  %v402_v4 = vld [vmem:[%s635_s0 - $0xaf] ss:$48 sm:%s283_s7]  }
  0x1c   :  { %v281_v3 = vsel %vm22_vm0, %v401_v1, %v400_v63  ;;  %v403_v5 = vld [vmem:[%s635_s0 - $0x107] ss:$48 sm:%s288_s11]   ;;  %8 = vst.msk [vmem:[#allocation0] ss:$8 sm:$0x30] %vm6_vm4, %v5_v6  }
  0x1d   :  { %310 = vrot.lane.b32.xlu1 %v309_v0, %s424_s27  ;;  %v286_v7 = vsel %vm27_vm1, %v402_v4, %v281_v3  ;;  %7 = vst.msk [vmem:[#allocation0] ss:$8 sm:$0xf] %vm6_vm4, %v5_v6   ;;  %10 = vst.msk [vmem:[#allocation0 - $0x2f] ss:$8 sm:$0xc0] %vm6_vm4, %v5_v6  }
  0x1e   :  { %v291_v9 = vsel %vm32_vm2, %v403_v5, %v286_v7  ;;  %15 = vst.msk [vmem:[#allocation0 + $0x11] ss:$8 sm:$0xf] %vm6_vm4, %v363_v8  }
  0x1f   :  { %292 = vrot.lane.b32.xlu0 %v291_v9, %s424_s27 }
  0x76   :  { %v96_v10 = vpop.permute.xlu1 %95  }
  0x77   :  { %v53_v11 = vpop.permute.xlu0 %52  }
  0x78   :  { %56 = vst.msk [vmem:[#allocation0 + $0x20] sm:$0x3] %vm36_vm5, %v53_v11   ;;  %58 = vst.msk [vmem:[#allocation0 + $0x26] sm:$0xc] %vm36_vm5, %v53_v11  }
  0x79   :  { %99 = vst.msk [vmem:[#allocation0 + $0x20] sm:$0x3] %vm79_vm6, %v96_v10   ;;  %101 = vst.msk [vmem:[#allocation0 + $0x26] sm:$0xc] %vm79_vm6, %v96_v10  }
  0x7a   :  { %v78_v12 = vpop.permute.xlu1 %77  }
  0x7c   :  { %v35_v13 = vpop.permute.xlu0 %34  }
  0x7d   :  { %37 = vst.msk [vmem:[#allocation0] sm:$0x3] %vm36_vm5, %v35_v13   ;;  %39 = vst.msk [vmem:[#allocation0 + $0x6] sm:$0xc] %vm36_vm5, %v35_v13  }
  0x7e   :  { %41 = vst.msk [vmem:[#allocation0 + $0xc] sm:$0x30] %vm36_vm5, %v35_v13   ;;  %43 = vst.msk [vmem:[#allocation0 + $0x12] sm:$0xc0] %vm36_vm5, %v35_v13  }
  0x7f   :  { %80 = vst.msk [vmem:[#allocation0] sm:$0x3] %vm79_vm6, %v78_v12   ;;  %82 = vst.msk [vmem:[#allocation0 + $0x6] sm:$0xc] %vm79_vm6, %v78_v12   ;;  %v139_v14 = vpop.permute.xlu1 %138  }
  0x80   :  { %84 = vst.msk [vmem:[#allocation0 + $0xc] sm:$0x30] %vm79_vm6, %v78_v12   ;;  %86 = vst.msk [vmem:[#allocation0 + $0x12] sm:$0xc0] %vm79_vm6, %v78_v12   ;;  %v121_v15 = vpop.permute.xlu0 %120  }
  0x81   :  { %142 = vst.msk [vmem:[#allocation0 + $0x20] sm:$0x3] %vm122_vm7, %v139_v14   ;;  %144 = vst.msk [vmem:[#allocation0 + $0x26] sm:$0xc] %vm122_vm7, %v139_v14  }
  0x82   :  { %123 = vst.msk [vmem:[#allocation0] sm:$0x3] %vm122_vm7, %v121_v15   ;;  %125 = vst.msk [vmem:[#allocation0 + $0x6] sm:$0xc] %vm122_vm7, %v121_v15  }
  0x83   :  { %127 = vst.msk [vmem:[#allocation0 + $0xc] sm:$0x30] %vm122_vm7, %v121_v15   ;;  %129 = vst.msk [vmem:[#allocation0 + $0x12] sm:$0xc0] %vm122_vm7, %v121_v15   ;;  %v182_v16 = vpop.permute.xlu1 %181  }
  0x84   :  { %185 = vst.msk [vmem:[#allocation0 + $0x20] sm:$0x3] %vm165_vm8, %v182_v16   ;;  %187 = vst.msk [vmem:[#allocation0 + $0x26] sm:$0xc] %vm165_vm8, %v182_v16   ;;  %v164_v17 = vpop.permute.xlu0 %163  }
  0x85   :  { %166 = vst.msk [vmem:[#allocation0] sm:$0x3] %vm165_vm8, %v164_v17   ;;  %168 = vst.msk [vmem:[#allocation0 + $0x6] sm:$0xc] %vm165_vm8, %v164_v17  }
  0x86   :  { %170 = vst.msk [vmem:[#allocation0 + $0xc] sm:$0x30] %vm165_vm8, %v164_v17   ;;  %172 = vst.msk [vmem:[#allocation0 + $0x12] sm:$0xc0] %vm165_vm8, %v164_v17  }
  0x87   :  { %v225_v18 = vpop.permute.xlu1 %224  }
  0x88   :  { %228 = vst.msk [vmem:[#allocation0 + $0x20] sm:$0x3] %vm208_vm9, %v225_v18   ;;  %230 = vst.msk [vmem:[#allocation0 + $0x26] sm:$0xc] %vm208_vm9, %v225_v18   ;;  %v207_v19 = vpop.permute.xlu0 %206  }
  0x89   :  { %209 = vst.msk [vmem:[#allocation0] sm:$0x3] %vm208_vm9, %v207_v19   ;;  %211 = vst.msk [vmem:[#allocation0 + $0x6] sm:$0xc] %vm208_vm9, %v207_v19  }
  0x8a   :  { %213 = vst.msk [vmem:[#allocation0 + $0xc] sm:$0x30] %vm208_vm9, %v207_v19   ;;  %215 = vst.msk [vmem:[#allocation0 + $0x12] sm:$0xc0] %vm208_vm9, %v207_v19  }
  0x8b   :  { %v268_v20 = vpop.permute.xlu1 %267  }
  0x8c   :  { %271 = vst.msk [vmem:[#allocation0 + $0x20] sm:$0x3] %vm251_vm10, %v268_v20   ;;  %273 = vst.msk [vmem:[#allocation0 + $0x26] sm:$0xc] %vm251_vm10, %v268_v20   ;;  %v250_v21 = vpop.permute.xlu0 %249  }
  0x8d   :  { %252 = vst.msk [vmem:[#allocation0] sm:$0x3] %vm251_vm10, %v250_v21   ;;  %254 = vst.msk [vmem:[#allocation0 + $0x6] sm:$0xc] %vm251_vm10, %v250_v21  }
  0x8e   :  { %256 = vst.msk [vmem:[#allocation0 + $0xc] sm:$0x30] %vm251_vm10, %v250_v21   ;;  %258 = vst.msk [vmem:[#allocation0 + $0x12] sm:$0xc0] %vm251_vm10, %v250_v21  }
  0x8f   :  { %v311_v22 = vpop.permute.xlu1 %310  }
  0x90   :  { %314 = vst.msk [vmem:[#allocation0 + $0x20] sm:$0x3] %vm294_vm11, %v311_v22   ;;  %316 = vst.msk [vmem:[#allocation0 + $0x26] sm:$0xc] %vm294_vm11, %v311_v22  }
  0x91   :  { %v293_v23 = vpop.permute.xlu0 %292  }
  0x92   :  { %295 = vst.msk [vmem:[#allocation0] sm:$0x3] %vm294_vm11, %v293_v23   ;;  %297 = vst.msk [vmem:[#allocation0 + $0x6] sm:$0xc] %vm294_vm11, %v293_v23  }
  0x93   :  { %299 = vst.msk [vmem:[#allocation0 + $0xc] sm:$0x30] %vm294_vm11, %v293_v23   ;;  %301 = vst.msk [vmem:[#allocation0 + $0x12] sm:$0xc0] %vm294_vm11, %v293_v23  }
  0x97   :  { %v346_v24 = vld [vmem:[#allocation0 + $0x20] sm:$0x3]  ;;  %v353_v25 = vld [vmem:[#allocation0 + $0x28] sm:$0x3] }
  0x98   :  { %409 = vst [vmem:[%s636_s1 + $0x8] sm:$0x3] %v346_v24  ;;  %410 = vst [vmem:[%s636_s1 + $0xa] sm:$0x3] %v353_v25 }
  0x99   :  { %v321_v26 = vld [vmem:[#allocation0] sm:$0x3]  ;;  %v326_v27 = vld [vmem:[#allocation0 + $0x8] sm:$0x3] }
  0x9a   :  { %v332_v28 = vld [vmem:[#allocation0 + $0x10] sm:$0x3]  ;;  %324 = vst [vmem:[%s636_s1] sm:$0x3] %v321_v26  ;;  %406 = vst [vmem:[%s636_s1 + $0x2] sm:$0x3] %v326_v27 }
  0x9b   :  { %407 = vst [vmem:[%s636_s1 + $0x4] sm:$0x3] %v332_v28  ;;  %v339_v29 = vld [vmem:[#allocation0 + $0x18] sm:$0x3] }
  0x9c   :  { %408 = vst [vmem:[%s636_s1 + $0x6] sm:$0x3] %v339_v29 }

// kernel: _lambda_.1
= control target key start
LH: loop header
LB: loop body
LE: loop exit
PB: predicated region body
PF: predicated region fallthrough
CT: control target
= control target key end

     0   :  { %s214_s6 = smov 0   ;;  %s225_s0 = inlined_call_operand.vmem [shape: f32[8,384], index: 0, kind: input, shape index: {}]   ;;  %s226_s1 = inlined_call_operand.vmem [shape: f32[3,8,1], index: 1, kind: output, shape index: {}]  }
   0x1 LB: > { %s177_s7 = sadd.s32 4294967295, %s202_s6   ;;  %p181_p0 = scmp.ge.s32.totalorder %s202_s6, 1  ;;  %s202_s6 = sphi %s214_s6, %s11_s6  }
   0x2   : > { %p86_p1 = scmp.lt.s32.totalorder %s202_s6, 4 }
   0x4   : > { %p87_p2 = pnand %p181_p0, %p86_p1 }
   0x5   : > { %p104_p3 = scmp.lt.s32.totalorder (!%p87_p2), %s177_s7, 2 }
   0x6   : > { %90 = sbr.rel (%p87_p2) target bundleno = 176 (0xb0), region = 24 }
   0xb   : > { %s228_s7 = smov (!%p104_p3, %s177_s7), 2  ;;  %vm122_vm0 = vcmask 7168  }
   0xc   : > { %s182_s8 = sshll.u32 %s228_s7, 3 }
   0xd   : > { %s107_s11 = scalar_lea.vmem %s225_s0, %s182_s8  ;;  %s111_s14 = scalar_lea.vmem %s226_s1, %s182_s8 }
   0xe   : > { %v112_v0 = vld [vmem:[%s107_s11] sm:$0xff] }
   0xf   : > { %v115_v1 = vsub.f32 1.0, %v112_v0  ;;  %v113_v3 = vmul.f32 -0.75, %v112_v0 }
  0x11   : > { %v116_v2 = vadd.f32 1e-16, %v115_v1  ;;  %v114_v4 = vmul.f32 %v113_v3, %v112_v0 }
  0x13   : > { %194 = vlog2.f32 %v116_v2 }
  0x20   : > { %v195_v5 = vpop.eup %194 }
  0x21   : > { %v118_v6 = vmul.f32 0.6931472, %v195_v5 }
  0x23   : > { %v119_v7 = vmul.f32 %v118_v6, %v114_v4 }
  0x25   : > { %120 = vadd.xlane.f32.xlu0 %v119_v7 }
  0xae   : > { %v121_v8 = vpop.xlane.xlu0 %120 }
  0xaf   : > { %123 = vst.msk [vmem:[%s111_s14] sm:$0xff] %vm122_vm0, %v121_v8 }
  0xb0 PF: > { %s11_s6 = sadd.s32 1, %s202_s6  }
  0xb1   : > { %p8_p4 = scmp.ge.s32.totalorder %s11_s6, 5  }
  0xb3   :  { %10 = sbr.rel (!%p8_p4) target bundleno = 1 (0x1), region = 54 }

</bundles_post_ra>
